<compile_context>
chip_gen: v7x
topology: tpu7x:2x2x1
jax: 0.10.0
libtpu: 0.0.40
codegen_flags: <defaults>
</compile_context>

<pallas_src>
import functools

import jax
import jax.numpy as jnp
from jax.experimental import pallas as pl
from jax.experimental.pallas import tpu as pltpu

EPS = 1e-5   # nn.LayerNorm default eps (also Swin's layer_norm_eps)
LANE = 128


def _round_up(x, m):
    return (x + m - 1) // m * m


def _pad_axis(a, target, axis):
    pad = target - a.shape[axis]
    if pad <= 0:
        return a
    widths = [(0, 0)] * a.ndim
    widths[axis] = (0, pad)
    return jnp.pad(a, widths)


def _masked_layernorm(v, gamma, beta, h_true):
    """LayerNorm over the last (padded) axis using only the first h_true lanes.

    Requires padded lanes of `v` to be exactly zero on entry; gamma/beta are
    zero-padded so padded lanes stay exactly zero on exit.
    """
    lane = jax.lax.broadcasted_iota(jnp.int32, v.shape, v.ndim - 1)
    valid = lane < h_true
    inv_h = 1.0 / float(h_true)
    mu = jnp.sum(v, axis=-1, keepdims=True) * inv_h          # padded lanes are 0
    centered = jnp.where(valid, v - mu, 0.0)
    var = jnp.sum(centered * centered, axis=-1, keepdims=True) * inv_h
    return centered * jax.lax.rsqrt(var + EPS) * gamma + beta


def _fused_kernel(x_ref, w_emb_ref, b_emb_ref, g_pe_ref, be_pe_ref,
                  g_ln_ref, be_ln_ref, g_cls_ref, be_cls_ref,
                  w_cls_ref, b_cls_ref, o_ref, acc_ref, *, h_true, n_tokens):
    t = pl.program_id(1)

    @pl.when(t == 0)
    def _init():
        acc_ref[...] = jnp.zeros_like(acc_ref)

    # --- patch embedding: Conv2d(k=P, s=P) as matmul (bf16 MXU, f32 acc) ---
    x = x_ref[0]                                             # [TN, K_pad] bf16
    emb = jnp.dot(x, w_emb_ref[...], preferred_element_type=jnp.float32)
    emb = emb + b_emb_ref[...]                               # padded lanes stay 0

    # patch-embed LayerNorm
    h = _masked_layernorm(emb, g_pe_ref[...], be_pe_ref[...], h_true)

    # TODO(synk): Swin encoder stages (shifted-window attention, patch merging)
    # require the pretrained checkpoint; treated as identity here.

    # Swin final LayerNorm, then accumulate the token sum for the pooler.
    h = _masked_layernorm(h, g_ln_ref[...], be_ln_ref[...], h_true)
    acc_ref[...] += jnp.sum(h, axis=0, keepdims=True)        # [1, H_pad]

    @pl.when(t == pl.num_programs(1) - 1)
    def _finalize():
        pooled = acc_ref[...] * (1.0 / float(n_tokens))      # AdaptiveAvgPool1d(1)
        pn = _masked_layernorm(pooled, g_cls_ref[...], be_cls_ref[...], h_true)
        logits = jnp.dot(pn.astype(jnp.bfloat16), w_cls_ref[...],
                         preferred_element_type=jnp.float32) + b_cls_ref[...]
        o_ref[0] = logits.astype(o_ref.dtype)                # [1, NC_pad]


def _token_tile(n, max_tile=256):
    """Largest tile that divides n and keeps bf16 sublane tiling (mult. of 16)."""
    t = min(n, max_tile)
    for cand in range(t, 0, -1):
        if n % cand == 0 and (cand % 16 == 0 or cand == n):
            return cand
    return n


def swin_baseline_classifier(x_nchw, params, *, patch=4, token_tile=None):
    """x_nchw: [B, C, H, W] float32. Returns logits [B, num_classes] float32."""
    B, C, H, W = x_nchw.shape
    P = patch
    nh, nw = H // P, W // P
    N = nh * nw
    K = C * P * P
    hidden = params["w_emb"].shape[1]
    num_classes = params["w_cls"].shape[1]

    K_pad = _round_up(K, LANE)
    H_pad = _round_up(hidden, LANE)
    NC_pad = _round_up(num_classes, LANE)

    TN = token_tile if token_tile is not None else _token_tile(N)
    assert N % TN == 0, "token tile must divide the number of patches"

    # --- glue: non-overlapping patches, channel-major inside a patch (matches
    # Conv2d weight [out, C, P, P] flattening); zero-pad K to a lane multiple,
    # cast to bf16 so the kernel DMAs half the bytes and feeds the MXU bf16.
    patches = x_nchw.reshape(B, C, nh, P, nw, P)
    patches = jnp.transpose(patches, (0, 2, 4, 1, 3, 5)).reshape(B, N, K)
    patches = _pad_axis(patches, K_pad, 2).astype(jnp.bfloat16)

    # zero-pad parameters: padded lanes stay exactly zero through the pipeline.
    w_emb = _pad_axis(_pad_axis(params["w_emb"], K_pad, 0), H_pad, 1).astype(jnp.bfloat16)
    b_emb = _pad_axis(params["b_emb"], H_pad, 1)
    g_pe = _pad_axis(params["pe_gamma"], H_pad, 1)
    be_pe = _pad_axis(params["pe_beta"], H_pad, 1)
    g_ln = _pad_axis(params["ln_gamma"], H_pad, 1)
    be_ln = _pad_axis(params["ln_beta"], H_pad, 1)
    g_cls = _pad_axis(params["cls_gamma"], H_pad, 1)
    be_cls = _pad_axis(params["cls_beta"], H_pad, 1)
    w_cls = _pad_axis(_pad_axis(params["w_cls"], H_pad, 0), NC_pad, 1).astype(jnp.bfloat16)
    b_cls = _pad_axis(params["b_cls"], NC_pad, 1)

    kernel = functools.partial(_fused_kernel, h_true=hidden, n_tokens=N)
    res2 = lambda b, t: (0, 0)   # weights / scales: resident in VMEM across grid

    logits_pad = pl.pallas_call(
        kernel,
        out_shape=jax.ShapeDtypeStruct((B, 1, NC_pad), jnp.float32),
        grid_spec=pltpu.PrefetchScalarGridSpec(
            num_scalar_prefetch=0,
            grid=(B, N // TN),
            in_specs=[
                pl.BlockSpec((1, TN, K_pad), lambda b, t: (b, t, 0)),   # patches
                pl.BlockSpec((K_pad, H_pad), res2),                     # w_emb
                pl.BlockSpec((1, H_pad), res2),                         # b_emb
                pl.BlockSpec((1, H_pad), res2),                         # pe gamma
                pl.BlockSpec((1, H_pad), res2),                         # pe beta
                pl.BlockSpec((1, H_pad), res2),                         # ln gamma
                pl.BlockSpec((1, H_pad), res2),                         # ln beta
                pl.BlockSpec((1, H_pad), res2),                         # cls gamma
                pl.BlockSpec((1, H_pad), res2),                         # cls beta
                pl.BlockSpec((H_pad, NC_pad), res2),                    # w_cls
                pl.BlockSpec((1, NC_pad), res2),                        # b_cls
            ],
            out_specs=pl.BlockSpec((1, 1, NC_pad), lambda b, t: (b, 0, 0)),
            scratch_shapes=[pltpu.VMEM((1, H_pad), jnp.float32)],
        ),
        compiler_params=pltpu.CompilerParams(
            dimension_semantics=("parallel", "arbitrary"),
            vmem_limit_bytes=32 * 1024 * 1024,
        ),
    )(patches, w_emb, b_emb, g_pe, be_pe, g_ln, be_ln, g_cls, be_cls,
      w_cls, b_cls)

    return logits_pad[:, 0, :num_classes]


def init_params(key, *, in_ch=3, patch=4, hidden=32, num_classes=5):
    ks = jax.random.split(key, 2)
    d_in = in_ch * patch * patch
    return {
        # patch embedding projection (Conv2d k=4, s=4 as matmul) + its LayerNorm
        "w_emb": jax.random.normal(ks[0], (d_in, hidden), jnp.float32) * 0.02,
        "b_emb": jnp.zeros((1, hidden), jnp.float32),
        "pe_gamma": jnp.ones((1, hidden), jnp.float32),
        "pe_beta": jnp.zeros((1, hidden), jnp.float32),
        # swin final layernorm
        "ln_gamma": jnp.ones((1, hidden), jnp.float32),
        "ln_beta": jnp.zeros((1, hidden), jnp.float32),
        # classifier: LayerNorm + Linear
        "cls_gamma": jnp.ones((1, hidden), jnp.float32),
        "cls_beta": jnp.zeros((1, hidden), jnp.float32),
        "w_cls": jax.random.normal(ks[1], (hidden, num_classes), jnp.float32) * 0.02,
        "b_cls": jnp.zeros((1, num_classes), jnp.float32),
    }


if __name__ == "__main__":
    key = jax.random.PRNGKey(0)
    k_x, k_p = jax.random.split(key)

    B, C, H, W = 2, 3, 32, 32          # NCHW, like the PyTorch module's input
    num_classes = 5
    x = jax.random.normal(k_x, (B, C, H, W), jnp.float32)
    params = init_params(k_p, in_ch=C, patch=4, hidden=32, num_classes=num_classes)

    # token_tile=16 -> N=64 patches split into 4 token tiles per image, so the
    # pooler accumulation (pl.when init/finalize) path is exercised.
    fn = jax.jit(lambda xx: swin_baseline_classifier(xx, params, patch=4,
                                                     token_tile=16))
    logits = fn(x)
    jax.block_until_ready(logits)
    assert logits.shape == (B, num_classes)
    print("KERNEL_OK")
</pallas_src>

<mosaic_0001>
module attributes {stable_mosaic.version = 11 : i64} {
  func.func @_fused_kernel(%arg0: i32, %arg1: i32, %arg2: memref<1x16x128xbf16, #tpu.memory_space<vmem>>, %arg3: memref<128x128xbf16, #tpu.memory_space<vmem>>, %arg4: memref<1x128xf32, #tpu.memory_space<vmem>>, %arg5: memref<1x128xf32, #tpu.memory_space<vmem>>, %arg6: memref<1x128xf32, #tpu.memory_space<vmem>>, %arg7: memref<1x128xf32, #tpu.memory_space<vmem>>, %arg8: memref<1x128xf32, #tpu.memory_space<vmem>>, %arg9: memref<1x128xf32, #tpu.memory_space<vmem>>, %arg10: memref<1x128xf32, #tpu.memory_space<vmem>>, %arg11: memref<128x128xbf16, #tpu.memory_space<vmem>>, %arg12: memref<1x128xf32, #tpu.memory_space<vmem>>, %arg13: memref<1x1x128xf32, #tpu.memory_space<vmem>>, %arg14: memref<1x128xf32, #tpu.memory_space<vmem>>) attributes {dimension_semantics = [#tpu.dimension_semantics<parallel>, #tpu.dimension_semantics<arbitrary>], iteration_bounds = array<i64: 2, 4>, scalar_prefetch = 0 : i64, scratch_operands = 1 : i64, tpu.core_type = #tpu.core_type<tc>, window_params = [{transform_indices = @transform_0, window_bounds = array<i64: 1, 16, 128>}, {pipeline_mode = #tpu.pipeline_mode<synchronous>, transform_indices = @transform_1, window_bounds = array<i64: 128, 128>}, {pipeline_mode = #tpu.pipeline_mode<synchronous>, transform_indices = @transform_2, window_bounds = array<i64: 1, 128>}, {pipeline_mode = #tpu.pipeline_mode<synchronous>, transform_indices = @transform_3, window_bounds = array<i64: 1, 128>}, {pipeline_mode = #tpu.pipeline_mode<synchronous>, transform_indices = @transform_4, window_bounds = array<i64: 1, 128>}, {pipeline_mode = #tpu.pipeline_mode<synchronous>, transform_indices = @transform_5, window_bounds = array<i64: 1, 128>}, {pipeline_mode = #tpu.pipeline_mode<synchronous>, transform_indices = @transform_6, window_bounds = array<i64: 1, 128>}, {pipeline_mode = #tpu.pipeline_mode<synchronous>, transform_indices = @transform_7, window_bounds = array<i64: 1, 128>}, {pipeline_mode = #tpu.pipeline_mode<synchronous>, transform_indices = @transform_8, window_bounds = array<i64: 1, 128>}, {pipeline_mode = #tpu.pipeline_mode<synchronous>, transform_indices = @transform_9, window_bounds = array<i64: 128, 128>}, {pipeline_mode = #tpu.pipeline_mode<synchronous>, transform_indices = @transform_10, window_bounds = array<i64: 1, 128>}, {transform_indices = @transform_11, window_bounds = array<i64: 1, 1, 128>}]} {
    %c0_i32 = arith.constant 0 : i32
    %0 = arith.cmpi eq, %arg1, %c0_i32 : i32
    %1 = arith.extui %0 : i1 to i32
    %c0_i32_0 = arith.constant 0 : i32
    %2 = arith.cmpi ne, %1, %c0_i32_0 : i32
    scf.if %2 {
      %cst_34 = arith.constant 0.000000e+00 : f32
      %72 = vector.broadcast %cst_34 : f32 to vector<1x128xf32>
      %c0_35 = arith.constant 0 : index
      %c0_36 = arith.constant 0 : index
      %73 = vector.load %arg14[%c0_35, %c0_36] : memref<1x128xf32, #tpu.memory_space<vmem>>, vector<1x128xf32>
      tpu.vector_store %arg14[%c0_35, %c0_36], %72 {strides = array<i32>} : memref<1x128xf32, #tpu.memory_space<vmem>>, vector<1x128xf32>,
    } else {
    }
    %c0 = arith.constant 0 : index
    %c0_1 = arith.constant 0 : index
    %c0_2 = arith.constant 0 : index
    %3 = vector.load %arg2[%c0, %c0_1, %c0_2] : memref<1x16x128xbf16, #tpu.memory_space<vmem>>, vector<1x16x128xbf16>
    %4 = vector.shape_cast %3 : vector<1x16x128xbf16> to vector<16x128xbf16>
    %c0_3 = arith.constant 0 : index
    %c0_4 = arith.constant 0 : index
    %5 = vector.load %arg3[%c0_3, %c0_4] : memref<128x128xbf16, #tpu.memory_space<vmem>>, vector<128x128xbf16>
    %cst = arith.constant dense<0.000000e+00> : vector<16x128xf32>
    %6 = tpu.matmul %4, %5, %cst {dimension_numbers = #tpu.dot_dimension_numbers<[1], [0], [0], [1], [0, 0, 1, 1], [], []>} : vector<16x128xbf16>, vector<128x128xbf16>, vector<16x128xf32> -> vector<16x128xf32>
    %c0_5 = arith.constant 0 : index
    %c0_6 = arith.constant 0 : index
    %7 = vector.load %arg4[%c0_5, %c0_6] : memref<1x128xf32, #tpu.memory_space<vmem>>, vector<1x128xf32>
    %8 = vector.broadcast %7 : vector<1x128xf32> to vector<16x128xf32>
    %9 = arith.addf %6, %8 : vector<16x128xf32>
    %c0_7 = arith.constant 0 : index
    %c0_8 = arith.constant 0 : index
    %10 = vector.load %arg5[%c0_7, %c0_8] : memref<1x128xf32, #tpu.memory_space<vmem>>, vector<1x128xf32>
    %c0_9 = arith.constant 0 : index
    %c0_10 = arith.constant 0 : index
    %11 = vector.load %arg6[%c0_9, %c0_10] : memref<1x128xf32, #tpu.memory_space<vmem>>, vector<1x128xf32>
    %12 = tpu.iota {dimensions = array<i32: 1>} : vector<16x128xi32>
    %c32_i32 = arith.constant 32 : i32
    %13 = vector.broadcast %c32_i32 : i32 to vector<16x128xi32>
    %14 = arith.cmpi slt, %12, %13 : vector<16x128xi32>
    %cst_11 = arith.constant dense<0.000000e+00> : vector<16xf32>
    %15 = vector.multi_reduction <add>, %9, %cst_11 [1] : vector<16x128xf32> to vector<16xf32>
    %16 = vector.shape_cast %15 : vector<16xf32> to vector<16x1xf32>
    %cst_12 = arith.constant 3.125000e-02 : f32
    %17 = vector.broadcast %cst_12 : f32 to vector<16x1xf32>
    %18 = arith.mulf %16, %17 : vector<16x1xf32>
    %19 = vector.broadcast %18 : vector<16x1xf32> to vector<16x128xf32>
    %20 = arith.subf %9, %19 : vector<16x128xf32>
    %cst_13 = arith.constant 0.000000e+00 : f32
    %21 = vector.broadcast %cst_13 : f32 to vector<16x128xf32>
    %22 = arith.select %14, %20, %21 : vector<16x128xi1>, vector<16x128xf32>
    %23 = arith.mulf %22, %22 : vector<16x128xf32>
    %cst_14 = arith.constant dense<0.000000e+00> : vector<16xf32>
    %24 = vector.multi_reduction <add>, %23, %cst_14 [1] : vector<16x128xf32> to vector<16xf32>
    %25 = vector.shape_cast %24 : vector<16xf32> to vector<16x1xf32>
    %cst_15 = arith.constant 3.125000e-02 : f32
    %26 = vector.broadcast %cst_15 : f32 to vector<16x1xf32>
    %27 = arith.mulf %25, %26 : vector<16x1xf32>
    %cst_16 = arith.constant 9.99999974E-6 : f32
    %28 = vector.broadcast %cst_16 : f32 to vector<16x1xf32>
    %29 = arith.addf %27, %28 : vector<16x1xf32>
    %30 = math.rsqrt %29 : vector<16x1xf32>
    %31 = vector.broadcast %30 : vector<16x1xf32> to vector<16x128xf32>
    %32 = arith.mulf %22, %31 : vector<16x128xf32>
    %33 = vector.broadcast %10 : vector<1x128xf32> to vector<16x128xf32>
    %34 = arith.mulf %32, %33 : vector<16x128xf32>
    %35 = vector.broadcast %11 : vector<1x128xf32> to vector<16x128xf32>
    %36 = arith.addf %34, %35 : vector<16x128xf32>
    %c0_17 = arith.constant 0 : index
    %c0_18 = arith.constant 0 : index
    %37 = vector.load %arg7[%c0_17, %c0_18] : memref<1x128xf32, #tpu.memory_space<vmem>>, vector<1x128xf32>
    %c0_19 = arith.constant 0 : index
    %c0_20 = arith.constant 0 : index
    %38 = vector.load %arg8[%c0_19, %c0_20] : memref<1x128xf32, #tpu.memory_space<vmem>>, vector<1x128xf32>
    %39 = tpu.iota {dimensions = array<i32: 1>} : vector<16x128xi32>
    %c32_i32_21 = arith.constant 32 : i32
    %40 = vector.broadcast %c32_i32_21 : i32 to vector<16x128xi32>
    %41 = arith.cmpi slt, %39, %40 : vector<16x128xi32>
    %cst_22 = arith.constant dense<0.000000e+00> : vector<16xf32>
    %42 = vector.multi_reduction <add>, %36, %cst_22 [1] : vector<16x128xf32> to vector<16xf32>
    %43 = vector.shape_cast %42 : vector<16xf32> to vector<16x1xf32>
    %cst_23 = arith.constant 3.125000e-02 : f32
    %44 = vector.broadcast %cst_23 : f32 to vector<16x1xf32>
    %45 = arith.mulf %43, %44 : vector<16x1xf32>
    %46 = vector.broadcast %45 : vector<16x1xf32> to vector<16x128xf32>
    %47 = arith.subf %36, %46 : vector<16x128xf32>
    %cst_24 = arith.constant 0.000000e+00 : f32
    %48 = vector.broadcast %cst_24 : f32 to vector<16x128xf32>
    %49 = arith.select %41, %47, %48 : vector<16x128xi1>, vector<16x128xf32>
    %50 = arith.mulf %49, %49 : vector<16x128xf32>
    %cst_25 = arith.constant dense<0.000000e+00> : vector<16xf32>
    %51 = vector.multi_reduction <add>, %50, %cst_25 [1] : vector<16x128xf32> to vector<16xf32>
    %52 = vector.shape_cast %51 : vector<16xf32> to vector<16x1xf32>
    %cst_26 = arith.constant 3.125000e-02 : f32
    %53 = vector.broadcast %cst_26 : f32 to vector<16x1xf32>
    %54 = arith.mulf %52, %53 : vector<16x1xf32>
    %cst_27 = arith.constant 9.99999974E-6 : f32
    %55 = vector.broadcast %cst_27 : f32 to vector<16x1xf32>
    %56 = arith.addf %54, %55 : vector<16x1xf32>
    %57 = math.rsqrt %56 : vector<16x1xf32>
    %58 = vector.broadcast %57 : vector<16x1xf32> to vector<16x128xf32>
    %59 = arith.mulf %49, %58 : vector<16x128xf32>
    %60 = vector.broadcast %37 : vector<1x128xf32> to vector<16x128xf32>
    %61 = arith.mulf %59, %60 : vector<16x128xf32>
    %62 = vector.broadcast %38 : vector<1x128xf32> to vector<16x128xf32>
    %63 = arith.addf %61, %62 : vector<16x128xf32>
    %c0_28 = arith.constant 0 : index
    %c0_29 = arith.constant 0 : index
    %64 = vector.load %arg14[%c0_28, %c0_29] : memref<1x128xf32, #tpu.memory_space<vmem>>, vector<1x128xf32>
    %cst_30 = arith.constant dense<0.000000e+00> : vector<128xf32>
    %65 = vector.multi_reduction <add>, %63, %cst_30 [0] : vector<16x128xf32> to vector<128xf32>
    %66 = vector.shape_cast %65 : vector<128xf32> to vector<1x128xf32>
    %67 = arith.addf %64, %66 : vector<1x128xf32>
    %c0_31 = arith.constant 0 : index
    %c0_32 = arith.constant 0 : index
    %68 = vector.load %arg14[%c0_31, %c0_32] : memref<1x128xf32, #tpu.memory_space<vmem>>, vector<1x128xf32>
    tpu.vector_store %arg14[%c0_31, %c0_32], %67 {strides = array<i32>} : memref<1x128xf32, #tpu.memory_space<vmem>>, vector<1x128xf32>,
    %c3_i32 = arith.constant 3 : i32
    %69 = arith.cmpi eq, %arg1, %c3_i32 : i32
    %70 = arith.extui %69 : i1 to i32
    %c0_i32_33 = arith.constant 0 : i32
    %71 = arith.cmpi ne, %70, %c0_i32_33 : i32
    scf.if %71 {
      %c0_34 = arith.constant 0 : index
      %c0_35 = arith.constant 0 : index
      %72 = vector.load %arg14[%c0_34, %c0_35] : memref<1x128xf32, #tpu.memory_space<vmem>>, vector<1x128xf32>
      %cst_36 = arith.constant 1.562500e-02 : f32
      %73 = vector.broadcast %cst_36 : f32 to vector<1x128xf32>
      %74 = arith.mulf %72, %73 : vector<1x128xf32>
      %c0_37 = arith.constant 0 : index
      %c0_38 = arith.constant 0 : index
      %75 = vector.load %arg9[%c0_37, %c0_38] : memref<1x128xf32, #tpu.memory_space<vmem>>, vector<1x128xf32>
      %c0_39 = arith.constant 0 : index
      %c0_40 = arith.constant 0 : index
      %76 = vector.load %arg10[%c0_39, %c0_40] : memref<1x128xf32, #tpu.memory_space<vmem>>, vector<1x128xf32>
      %77 = tpu.iota {dimensions = array<i32: 1>} : vector<1x128xi32>
      %c32_i32_41 = arith.constant 32 : i32
      %78 = vector.broadcast %c32_i32_41 : i32 to vector<1x128xi32>
      %79 = arith.cmpi slt, %77, %78 : vector<1x128xi32>
      %cst_42 = arith.constant dense<0.000000e+00> : vector<1xf32>
      %80 = vector.multi_reduction <add>, %74, %cst_42 [1] : vector<1x128xf32> to vector<1xf32>
      %81 = vector.shape_cast %80 : vector<1xf32> to vector<1x1xf32>
      %cst_43 = arith.constant 3.125000e-02 : f32
      %82 = vector.broadcast %cst_43 : f32 to vector<1x1xf32>
      %83 = arith.mulf %81, %82 : vector<1x1xf32>
      %84 = vector.broadcast %83 : vector<1x1xf32> to vector<1x128xf32>
      %85 = arith.subf %74, %84 : vector<1x128xf32>
      %cst_44 = arith.constant 0.000000e+00 : f32
      %86 = vector.broadcast %cst_44 : f32 to vector<1x128xf32>
      %87 = arith.select %79, %85, %86 : vector<1x128xi1>, vector<1x128xf32>
      %88 = arith.mulf %87, %87 : vector<1x128xf32>
      %cst_45 = arith.constant dense<0.000000e+00> : vector<1xf32>
      %89 = vector.multi_reduction <add>, %88, %cst_45 [1] : vector<1x128xf32> to vector<1xf32>
      %90 = vector.shape_cast %89 : vector<1xf32> to vector<1x1xf32>
      %cst_46 = arith.constant 3.125000e-02 : f32
      %91 = vector.broadcast %cst_46 : f32 to vector<1x1xf32>
      %92 = arith.mulf %90, %91 : vector<1x1xf32>
      %cst_47 = arith.constant 9.99999974E-6 : f32
      %93 = vector.broadcast %cst_47 : f32 to vector<1x1xf32>
      %94 = arith.addf %92, %93 : vector<1x1xf32>
      %95 = math.rsqrt %94 : vector<1x1xf32>
      %96 = vector.broadcast %95 : vector<1x1xf32> to vector<1x128xf32>
      %97 = arith.mulf %87, %96 : vector<1x128xf32>
      %98 = arith.mulf %97, %75 : vector<1x128xf32>
      %99 = arith.addf %98, %76 : vector<1x128xf32>
      %100 = arith.truncf %99 : vector<1x128xf32> to vector<1x128xbf16>
      %c0_48 = arith.constant 0 : index
      %c0_49 = arith.constant 0 : index
      %101 = vector.load %arg11[%c0_48, %c0_49] : memref<128x128xbf16, #tpu.memory_space<vmem>>, vector<128x128xbf16>
      %cst_50 = arith.constant dense<0.000000e+00> : vector<1x128xf32>
      %102 = tpu.matmul %100, %101, %cst_50 {dimension_numbers = #tpu.dot_dimension_numbers<[1], [0], [0], [1], [0, 0, 1, 1], [], []>} : vector<1x128xbf16>, vector<128x128xbf16>, vector<1x128xf32> -> vector<1x128xf32>
      %c0_51 = arith.constant 0 : index
      %c0_52 = arith.constant 0 : index
      %103 = vector.load %arg12[%c0_51, %c0_52] : memref<1x128xf32, #tpu.memory_space<vmem>>, vector<1x128xf32>
      %104 = arith.addf %102, %103 : vector<1x128xf32>
      %c0_53 = arith.constant 0 : index
      %c0_54 = arith.constant 0 : index
      %c0_55 = arith.constant 0 : index
      %105 = vector.load %arg13[%c0_53, %c0_54, %c0_55] : memref<1x1x128xf32, #tpu.memory_space<vmem>>, vector<1x1x128xf32>
      %106 = vector.shape_cast %105 : vector<1x1x128xf32> to vector<1x128xf32>
      %107 = vector.shape_cast %104 : vector<1x128xf32> to vector<1x1x128xf32>
      tpu.vector_store %arg13[%c0_53, %c0_54, %c0_55], %107 {strides = array<i32>} : memref<1x1x128xf32, #tpu.memory_space<vmem>>, vector<1x1x128xf32>,
    } else {
    }
    return
  }
  func.func @transform_0(%arg0: i32, %arg1: i32) -> (i32, i32, i32) {
    %c0_i32 = arith.constant 0 : i32
    %c0_i32_0 = arith.constant 0 : i32
    return %arg0, %arg1, %c0_i32 : i32, i32, i32
  }
  func.func @transform_1(%arg0: i32, %arg1: i32) -> (i32, i32) {
    %c0_i32 = arith.constant 0 : i32
    %c0_i32_0 = arith.constant 0 : i32
    %c0_i32_1 = arith.constant 0 : i32
    return %c0_i32, %c0_i32_0 : i32, i32
  }
  func.func @transform_2(%arg0: i32, %arg1: i32) -> (i32, i32) {
    %c0_i32 = arith.constant 0 : i32
    %c0_i32_0 = arith.constant 0 : i32
    %c0_i32_1 = arith.constant 0 : i32
    return %c0_i32, %c0_i32_0 : i32, i32
  }
  func.func @transform_3(%arg0: i32, %arg1: i32) -> (i32, i32) {
    %c0_i32 = arith.constant 0 : i32
    %c0_i32_0 = arith.constant 0 : i32
    %c0_i32_1 = arith.constant 0 : i32
    return %c0_i32, %c0_i32_0 : i32, i32
  }
  func.func @transform_4(%arg0: i32, %arg1: i32) -> (i32, i32) {
    %c0_i32 = arith.constant 0 : i32
    %c0_i32_0 = arith.constant 0 : i32
    %c0_i32_1 = arith.constant 0 : i32
    return %c0_i32, %c0_i32_0 : i32, i32
  }
  func.func @transform_5(%arg0: i32, %arg1: i32) -> (i32, i32) {
    %c0_i32 = arith.constant 0 : i32
    %c0_i32_0 = arith.constant 0 : i32
    %c0_i32_1 = arith.constant 0 : i32
    return %c0_i32, %c0_i32_0 : i32, i32
  }
  func.func @transform_6(%arg0: i32, %arg1: i32) -> (i32, i32) {
    %c0_i32 = arith.constant 0 : i32
    %c0_i32_0 = arith.constant 0 : i32
    %c0_i32_1 = arith.constant 0 : i32
    return %c0_i32, %c0_i32_0 : i32, i32
  }
  func.func @transform_7(%arg0: i32, %arg1: i32) -> (i32, i32) {
    %c0_i32 = arith.constant 0 : i32
    %c0_i32_0 = arith.constant 0 : i32
    %c0_i32_1 = arith.constant 0 : i32
    return %c0_i32, %c0_i32_0 : i32, i32
  }
  func.func @transform_8(%arg0: i32, %arg1: i32) -> (i32, i32) {
    %c0_i32 = arith.constant 0 : i32
    %c0_i32_0 = arith.constant 0 : i32
    %c0_i32_1 = arith.constant 0 : i32
    return %c0_i32, %c0_i32_0 : i32, i32
  }
  func.func @transform_9(%arg0: i32, %arg1: i32) -> (i32, i32) {
    %c0_i32 = arith.constant 0 : i32
    %c0_i32_0 = arith.constant 0 : i32
    %c0_i32_1 = arith.constant 0 : i32
    return %c0_i32, %c0_i32_0 : i32, i32
  }
  func.func @transform_10(%arg0: i32, %arg1: i32) -> (i32, i32) {
    %c0_i32 = arith.constant 0 : i32
    %c0_i32_0 = arith.constant 0 : i32
    %c0_i32_1 = arith.constant 0 : i32
    return %c0_i32, %c0_i32_0 : i32, i32
  }
  func.func @transform_11(%arg0: i32, %arg1: i32) -> (i32, i32, i32) {
    %c0_i32 = arith.constant 0 : i32
    %c0_i32_0 = arith.constant 0 : i32
    %c0_i32_1 = arith.constant 0 : i32
    return %arg0, %c0_i32, %c0_i32_0 : i32, i32, i32
  }
}

</mosaic_0001>

<bundles_post_ra>
// kernel: _lambda_.1
= control target key start
LH: loop header
LB: loop body
LE: loop exit
PB: predicated region body
PF: predicated region fallthrough
CT: control target
= control target key end

     0   :  { %16 = vsyncpa [#allocation4], 0  ;;  %s1437_s0 = inlined_call_operand.vmem [shape: bf16[2,64,128], index: 0, kind: input, shape index: {}]   ;;  %s1438_s1 = inlined_call_operand.vmem [shape: bf16[128,128], index: 1, kind: input, shape index: {}]   ;;  %s1439_s2 = inlined_call_operand.vmem [shape: f32[1,128], index: 2, kind: input, shape index: {}, may-alias: {2,4,6,8}]   ;;  %s1440_s3 = inlined_call_operand.vmem [shape: f32[1,128], index: 3, kind: input, shape index: {}, may-alias: {3,5,7}]   ;;  %s1441_s4 = inlined_call_operand.vmem [shape: f32[1,128], index: 4, kind: input, shape index: {}, may-alias: {2,4,6,8}]   ;;  %s1442_s5 = inlined_call_operand.vmem [shape: f32[1,128], index: 5, kind: input, shape index: {}, may-alias: {3,5,7}]   ;;  %s1443_s6 = inlined_call_operand.vmem [shape: f32[1,128], index: 6, kind: input, shape index: {}, may-alias: {2,4,6,8}]   ;;  %s1444_s7 = inlined_call_operand.vmem [shape: f32[1,128], index: 7, kind: input, shape index: {}, may-alias: {3,5,7}]   ;;  %s1445_s8 = inlined_call_operand.vmem [shape: f32[1,128], index: 8, kind: input, shape index: {}, may-alias: {2,4,6,8}]   ;;  %s1446_s9 = inlined_call_operand.vmem [shape: bf16[128,128], index: 9, kind: input, shape index: {}]   ;;  %s1447_s10 = inlined_call_operand.vmem [shape: f32[1,128], index: 10, kind: input, shape index: {}]   ;;  %s1448_s11 = inlined_call_operand.hbm [shape: f32[2,1,128], index: 11, kind: output, shape index: {}]  }
   0x1   :  { %18 = vsyncpa [#allocation4 + $0x1], 0  ;;  %s1210_s17 = smov 0   ;;  %s1212_s18 = smov 0  }
   0x2   :  { %s1214_s19 = smov 0   ;;  %s1216_s20 = smov 0  }
   0x3   :  { %s1218_s21 = smov 0   ;;  %s1220_s22 = smov 0  }
   0x4   :  { %s1222_s23 = smov 0   ;;  %s1224_s24 = smov 0  }
   0x5 LB: > { %1453 = sst [smem:[#allocation6_spill]] %s1122_s19  ;;  %s852_s25 = sadd.s32 4294967295, %s1142_s24   ;;  %s1142_s24 = sphi %s1224_s24, %s24_s24   ;;  %s1138_s23 = sphi %s1222_s23, %s1469_s23   ;;  %s1134_s22 = sphi %s1220_s22, %s1465_s22   ;;  %s1130_s21 = sphi %s1218_s21, %s1464_s21   ;;  %s1126_s20 = sphi %s1216_s20, %s1463_s20   ;;  %s1122_s19 = sphi %s1214_s19, %s1462_s19   ;;  %s1118_s18 = sphi %s1212_s18, %s1468_s18   ;;  %s1114_s17 = sphi %s1210_s17, %s1467_s17  }
   0x6   : > { %1454 = sst [smem:[#allocation7_spill]] %s1134_s22  ;;  %s853_s26 = sadd.s32 4294967294, %s1142_s24  }
   0x7   : > { %1455 = sst [smem:[#allocation8_spill]] %s1138_s23  ;;  %s33_s27 = sadd.s32 1, %s1134_s22 }
   0x8   : > { %p34_p0 = scmp.ge.s32.totalorder %s33_s27, 4  ;;  %s36_s28 = sadd.s32 1, %s1138_s23 }
   0x9   : > { %p291_p1 = scmp.ne.s32.totalorder %s1122_s19, %s1118_s18  ;;  %p292_p2 = scmp.eq.s32.totalorder %s852_s25, 7 }
   0xa   : > { %s1471_s27 = smov (%p34_p0, %s33_s27), 0  ;;  %s1473_s28 = smov (!%p34_p0, %s36_s28), %s1138_s23 }
   0xb   : > { %1456 = sst [smem:[#allocation9_spill]] %s1471_s27  ;;  %p1259_p3 = por %p292_p2, %p291_p1 }
   0xc   : > { %p297_p4 = scmp.ne.s32.totalorder %s1118_s18, %s1114_s17  ;;  %p38_p5 = scmp.ge.s32.totalorder %s1473_s28, 2 }
   0xd   : > { %p298_p6 = scmp.eq.s32.totalorder %s853_s26, 7  ;;  %p856_p7 = scmp.ge.s32.totalorder %s1142_s24, 1 }
   0xe   : > { %p359_p8 = scmp.lt.s32.totalorder %s1142_s24, 9  ;;  %s1475_s28 = smov (%p38_p5, %s1473_s28), 0 }
   0xf   : > { %1458 = sst [smem:[#allocation10_spill]] %s1475_s28  ;;  %p1269_p9 = por %p298_p6, %p297_p4 }
  0x10   : > { %p360_p10 = pnand %p856_p7, %p359_p8  ;;  %s278_s12 = ssub.s32 %s1138_s23, %s1475_s28 }
  0x11   : > { %s281_s13 = sadd.s32 1, %s1122_s19  ;;  %p279_p11 = scmp.eq.s32.totalorder %s278_s12, 0 }
  0x12   : > { %363 = sbr.rel (%p360_p10) target bundleno = 1489 (0x5d1), region = 64  ;;  %s400_s15 = sand.u32 (!%p360_p10), 1, %s1118_s18  }
  0x13   : > { %s1277_s14 = scalar_select %p279_p11, %s1122_s19, %s281_s13  }
  0x14   : > { %s857_s16 = sshll.u32 (!%p360_p10), %s1126_s20, 1  ;;  %p403_p12 = scmp.lt.s32.totalorder (!%p360_p10), %s1130_s21, 1 }
  0x15   : > { %1460 = sst [smem:[#allocation11_spill]] %s1277_s14  ;;  %p405_p13 = scmp.lt.s32.totalorder (!%p360_p10), %s857_s16, 7 }
  0x16   : > { %s1290_s13 = scalar_lea.vmem (!%p360_p10), [#allocation3], %s400_s15  ;;  %p860_p0 = scmp.ne.s32.totalorder (!%p360_p10), %s1126_s20, 0 }
  0x19   : > { %s404_s25 = scalar_select %p403_p12, %s1130_s21, 1 }
  0x1a   : > { %s1477_s16 = smov (!%p405_p13, %s857_s16), 7  ;;  %416 = sbr.rel (%p860_p0) target bundleno = 33 (0x21), region = 68 }
  0x1b   : > { %s858_s26 = sshll.u32 %s404_s25, 3  ;;  %v1144_v0 = vmov (!%p860_p0), 0.0  }
  0x1c   : > { %s408_s27 = sadd.s32 %s858_s26, %s1477_s16  ;;  %417 = vst [vmem:[#allocation2] sm:$0x1] (!%p860_p0), %v1144_v0 }
  0x1d   : > { %s859_s22 = sshll.u32 %s408_s27, 2 }
  0x1e   : > { %s1286_s12 = scalar_lea.vmem %s1437_s0, %s859_s22 }
  0x21 PF: > { %v1021_v1 = vld [vmem:[%s1438_s1] sm:$0xff]   ;;  %v1145_v2 = vmov 0.0   ;;  %v1022_v3 = vld [vmem:[%s1438_s1 + $0x8] sm:$0xff]   ;;  %vm1146_vm0 = vmmov 0   ;;  %v1023_v4 = vld [vmem:[%s1438_s1 + $0x10] sm:$0xff]   ;;  %v540_v18 = vlaneseq  ;;  %p875_p1 = scmp.ne.s32.totalorder %s1126_s20, 3 }
  0x22   : > { %905 = vmatprep.subr.bf16.mxu0 %v1145_v2  ;;  %921 = vmatprep.mubr.msk.bf16.mxu0 %vm1146_vm0, %v1145_v2  ;;  %v1024_v5 = vld [vmem:[%s1438_s1 + $0x18] sm:$0xff]   ;;  %v1025_v6 = vld [vmem:[%s1438_s1 + $0x20] sm:$0xff]   ;;  %v1026_v7 = vld [vmem:[%s1438_s1 + $0x28] sm:$0xff]   ;;  %vm643_vm2 = vcmask (!%p875_p1), 1040384   ;;  %vm1148_vm3 = vmmov (!%p875_p1), 0  }
  0x23   : > { %906 = vmatpush3.bf16.msra.mxu0 %v1021_v1  ;;  %v1027_v8 = vld [vmem:[%s1438_s1 + $0x30] sm:$0xff]   ;;  %v1028_v9 = vld [vmem:[%s1438_s1 + $0x38] sm:$0xff]   ;;  %v1029_v10 = vld [vmem:[%s1286_s12] sm:$0xff]   ;;  %v1321_v19 = vand.u32 127, %v540_v18 }
  0x24   : > { %907 = vmatprep.subr.bf16.mxu0 %v1145_v2  ;;  %v861_v11 = vld [vmem:[%s1439_s2] ss:$0 sm:$0xff] }
  0x25   : > { %vm542_vm1 = vcmp.lt.s32.totalorder %v1321_v19, 32  ;;  %v871_v37 = vld [vmem:[%s1440_s3] ss:$0 sm:$0xff] }
  0x26   : > { %v872_v39 = vld [vmem:[%s1441_s4] ss:$0 sm:$0xff] }
  0x27   : > { %908 = vmatpush3.bf16.msra.mxu0 %v1022_v3  ;;  %v873_v0 = vld [vmem:[%s1442_s5] ss:$0 sm:$0xff] }
  0x28   : > { %909 = vmatprep.subr.bf16.mxu0 %v1145_v2  ;;  %v1042_v19 = vld [vmem:[%s1446_s9 + $0x20] sm:$0xff] (!%p875_p1)  }
  0x2b   : > { %910 = vmatpush3.bf16.msra.mxu0 %v1023_v4  ;;  %v874_v4 = vld [vmem:[%s1443_s6] ss:$0 sm:$0xff] }
  0x2c   : > { %911 = vmatprep.subr.bf16.mxu0 %v1145_v2 }
  0x2f   : > { %912 = vmatpush3.bf16.msra.mxu0 %v1024_v5 }
  0x30   : > { %913 = vmatprep.subr.bf16.mxu0 %v1145_v2 }
  0x33   : > { %914 = vmatpush3.bf16.msra.mxu0 %v1025_v6 }
  0x34   : > { %915 = vmatprep.subr.bf16.mxu0 %v1145_v2 }
  0x37   : > { %916 = vmatpush3.bf16.msra.mxu0 %v1026_v7 }
  0x38   : > { %917 = vmatprep.subr.bf16.mxu0 %v1145_v2 }
  0x3b   : > { %918 = vmatpush3.bf16.msra.mxu0 %v1027_v8 }
  0x3c   : > { %919 = vmatprep.subr.bf16.mxu0 %v1145_v2 }
  0x3f   : > { %920 = vmatpush3.bf16.msra.mxu0 %v1028_v9 }
  0x42   : > { %922 = vmatmul.mubr.bf16.vlgmr.msra.gmra.mrb[0].mxu0 %v1029_v10 }
 0x115   : > { %v531_v12 = vpop.f32.mrb[0].mxu0 }
 0x116   : > { %v532_v13 = vadd.f32 %v861_v11, %v531_v12  ;;  %v923_v14 = vpop.f32.mrb[1].mxu0 }
 0x117   : > { %v534_v15 = vpop.f32.mrb[2].mxu0  ;;  %v625_v14 = vld [vmem:[#allocation2] sm:$0x1] }
 0x118   : > { %543 = vadd.xlane.f32.xlu0 %v532_v13  ;;  %v924_v16 = vpop.f32.mrb[3].mxu0  ;;  %v535_v17 = vadd.f32 %v861_v11, %v534_v15 }
 0x11c   : > { %545 = vadd.xlane.f32.xlu0 %v535_v17 }
 0x1a5   : > { %v544_v20 = vpop.xlane.xlu0 %543 }
 0x1a6   : > { %v547_v21 = vmul.f32 0.03125, %v544_v20 }
 0x1a8   : > { %v549_v22 = vsub.f32 %v532_v13, %v547_v21  ;;  %v1038_v21 = vld [vmem:[%s1446_s9] sm:$0xff] (!%p875_p1)  }
 0x1a9   : > { %v546_v23 = vpop.xlane.xlu0 %545 }
 0x1aa   : > { %v548_v24 = vmul.f32 0.03125, %v546_v23  ;;  %v551_v25 = vsel %vm542_vm1, %v549_v22, 0.0  ;;  %v1147_v22 = vmov (!%p875_p1), 0.0   ;;  %v1039_v23 = vld [vmem:[%s1446_s9 + $0x8] sm:$0xff] (!%p875_p1)  }
 0x1ab   : > { %v553_v26 = vmul.f32 %v551_v25, %v551_v25  ;;  %925 = vmatprep.subr.bf16.mxu0 (!%p875_p1), %v1147_v22  ;;  %941 = vmatprep.mubr.msk.bf16.mxu0 (!%p875_p1), %vm1148_vm3, %v1147_v22 }
 0x1ac   : > { %v550_v27 = vsub.f32 %v535_v17, %v548_v24  ;;  %926 = vmatpush3.bf16.msra.mxu0 (!%p875_p1), %v1038_v21 }
 0x1ad   : > { %555 = vadd.xlane.f32.xlu1 %v553_v26  ;;  %927 = vmatprep.subr.bf16.mxu0 (!%p875_p1), %v1147_v22 }
 0x1ae   : > { %v552_v28 = vsel %vm542_vm1, %v550_v27, 0.0 }
 0x1af   : > { %v554_v29 = vmul.f32 %v552_v28, %v552_v28 }
 0x1b0   : > { %928 = vmatpush3.bf16.msra.mxu0 (!%p875_p1), %v1039_v23 }
 0x1b1   : > { %557 = vadd.xlane.f32.xlu1 %v554_v29  ;;  %929 = vmatprep.subr.bf16.mxu0 (!%p875_p1), %v1147_v22 }
 0x23a   : > { %v556_v30 = vpop.xlane.xlu1 %555 }
 0x23b   : > { %v559_v31 = vmul.f32 0.03125, %v556_v30  ;;  %v1040_v30 = vld [vmem:[%s1446_s9 + $0x10] sm:$0xff] (!%p875_p1)  }
 0x23c   : > { %930 = vmatpush3.bf16.msra.mxu0 (!%p875_p1), %v1040_v30 }
 0x23d   : > { %v561_v32 = vadd.f32 1e-05, %v559_v31  ;;  %931 = vmatprep.subr.bf16.mxu0 (!%p875_p1), %v1147_v22  ;;  %v1041_v31 = vld [vmem:[%s1446_s9 + $0x18] sm:$0xff] (!%p875_p1)  }
 0x23e   : > { %v558_v33 = vpop.xlane.xlu1 %557 }
 0x23f   : > { %1030 = vrsqrt.f32 %v561_v32  ;;  %v560_v34 = vmul.f32 0.03125, %v558_v33  ;;  %v1043_v32 = vld [vmem:[%s1446_s9 + $0x28] sm:$0xff] (!%p875_p1)   ;;  %v1044_v33 = vld [vmem:[%s1446_s9 + $0x30] sm:$0xff] (!%p875_p1)  }
 0x240   : > { %932 = vmatpush3.bf16.msra.mxu0 (!%p875_p1), %v1041_v31 }
 0x241   : > { %v562_v35 = vadd.f32 1e-05, %v560_v34  ;;  %933 = vmatprep.subr.bf16.mxu0 (!%p875_p1), %v1147_v22  ;;  %v1045_v34 = vld [vmem:[%s1446_s9 + $0x38] sm:$0xff] (!%p875_p1)  }
 0x243   : > { %1032 = vrsqrt.f32 %v562_v35 }
 0x244   : > { %934 = vmatpush3.bf16.msra.mxu0 (!%p875_p1), %v1042_v19 }
 0x245   : > { %935 = vmatprep.subr.bf16.mxu0 (!%p875_p1), %v1147_v22 }
 0x248   : > { %936 = vmatpush3.bf16.msra.mxu0 (!%p875_p1), %v1043_v32 }
 0x249   : > { %v1031_v36 = vpop.eup %1030  ;;  %937 = vmatprep.subr.bf16.mxu0 (!%p875_p1), %v1147_v22 }
 0x24a   : > { %v565_v38 = vmul.f32 %v1031_v36, %v551_v25 }
 0x24c   : > { %v573_v40 = vmul.f32 %v871_v37, %v565_v38  ;;  %938 = vmatpush3.bf16.msra.mxu0 (!%p875_p1), %v1044_v33 }
 0x24d   : > { %v1033_v41 = vpop.eup %1032  ;;  %939 = vmatprep.subr.bf16.mxu0 (!%p875_p1), %v1147_v22 }
 0x24e   : > { %v581_v42 = vadd.f32 %v872_v39, %v573_v40  ;;  %v566_v43 = vmul.f32 %v1033_v41, %v552_v28  ;;  %v642_v41 = vld [vmem:[%s1445_s8] sm:$0x1] (!%p875_p1) }
 0x250   : > { %585 = vadd.xlane.f32.xlu0 %v581_v42  ;;  %v574_v44 = vmul.f32 %v871_v37, %v566_v43  ;;  %940 = vmatpush3.bf16.msra.mxu0 (!%p875_p1), %v1045_v34 }
 0x252   : > { %v582_v45 = vadd.f32 %v872_v39, %v574_v44  ;;  %v641_v39 = vld [vmem:[%s1444_s7] sm:$0x1] (!%p875_p1) }
 0x254   : > { %587 = vadd.xlane.f32.xlu1 %v582_v45 }
 0x2dd   : > { %v586_v46 = vpop.xlane.xlu0 %585 }
 0x2de   : > { %v589_v47 = vmul.f32 0.03125, %v586_v46 }
 0x2e0   : > { %v591_v48 = vsub.f32 %v581_v42, %v589_v47 }
 0x2e1   : > { %v588_v49 = vpop.xlane.xlu1 %587 }
 0x2e2   : > { %v590_v50 = vmul.f32 0.03125, %v588_v49  ;;  %v593_v51 = vsel %vm542_vm1, %v591_v48, 0.0 }
 0x2e3   : > { %v595_v52 = vmul.f32 %v593_v51, %v593_v51 }
 0x2e4   : > { %v592_v53 = vsub.f32 %v582_v45, %v590_v50  ;;  %v677_v45 = vld [vmem:[%s1447_s10] sm:$0x1] (!%p875_p1) }
 0x2e5   : > { %597 = vadd.xlane.f32.xlu0 %v595_v52 }
 0x2e6   : > { %v594_v54 = vsel %vm542_vm1, %v592_v53, 0.0 }
 0x2e7   : > { %v596_v55 = vmul.f32 %v594_v54, %v594_v54 }
 0x2e9   : > { %599 = vadd.xlane.f32.xlu1 %v596_v55 }
 0x372   : > { %v598_v56 = vpop.xlane.xlu0 %597 }
 0x373   : > { %v601_v57 = vmul.f32 0.03125, %v598_v56 }
 0x375   : > { %v603_v58 = vadd.f32 1e-05, %v601_v57 }
 0x376   : > { %v600_v59 = vpop.xlane.xlu1 %599 }
 0x377   : > { %1034 = vrsqrt.f32 %v603_v58  ;;  %v602_v60 = vmul.f32 0.03125, %v600_v59 }
 0x379   : > { %v604_v61 = vadd.f32 1e-05, %v602_v60 }
 0x37b   : > { %1036 = vrsqrt.f32 %v604_v61 }
 0x381   : > { %v1035_v62 = vpop.eup %1034 }
 0x382   : > { %v607_v63 = vmul.f32 %v1035_v62, %v593_v51 }
 0x384   : > { %v615_v2 = vmul.f32 %v873_v0, %v607_v63 }
 0x385   : > { %v1037_v1 = vpop.eup %1036 }
 0x386   : > { %v608_v3 = vmul.f32 %v1037_v1, %v594_v54  ;;  %v623_v6 = vadd.f32 %v874_v4, %v615_v2 }
 0x388   : > { %v616_v5 = vmul.f32 %v873_v0, %v608_v3 }
 0x38a   : > { %v624_v7 = vadd.f32 %v874_v4, %v616_v5 }
 0x38c   : > { %v626_v8 = vadd.f32 %v624_v7, %v623_v6 }
 0x38e   : > { %v627_v9 = vrot.slane %v626_v8, 4 }
 0x390   : > { %v628_v10 = vadd.f32 %v627_v9, %v626_v8 }
 0x392   : > { %v629_v11 = vrot.slane %v628_v10, 2 }
 0x394   : > { %v630_v12 = vadd.f32 %v629_v11, %v628_v10 }
 0x396   : > { %v631_v13 = vrot.slane %v630_v12, 1  ;;  %638 = sbr.rel (%p875_p1) target bundleno = 1465 (0x5b9), region = 72 }
 0x398   : > { %v632_v15 = vadd.f32 %v631_v13, %v630_v12 }
 0x39a   : > { %v633_v16 = vadd.f32 %v632_v15, %v625_v14 }
 0x39c   : > { %634 = vst [vmem:[#allocation2] sm:$0x1] %v633_v16 }
 0x3a3   : > { %v639_v17 = vld [vmem:[#allocation2] sm:$0x1] }
 0x3a4   : > { %v640_v18 = vmul.f32 0.015625, %v639_v17 }
 0x3a6   : > { %v644_v20 = vsel %vm643_vm2, %v640_v18, 0.0 }
 0x3a7   : > { %645 = vadd.xlane.f32.xlu0 %v644_v20 }
 0x434   : > { %v646_v24 = vpop.xlane.xlu0 %645 }
 0x435   : > { %v647_v25 = vmul.f32 0.03125, %v646_v24 }
 0x437   : > { %v648_v26 = vsub.f32 %v640_v18, %v647_v25 }
 0x439   : > { %v649_v27 = vsel %vm542_vm1, %v648_v26, 0.0 }
 0x43a   : > { %v650_v28 = vmul.f32 %v649_v27, %v649_v27 }
 0x43c   : > { %v651_v29 = vsel %vm643_vm2, %v650_v28, 0.0 }
 0x43d   : > { %652 = vadd.xlane.f32.xlu0 %v651_v29 }
 0x4ca   : > { %v653_v35 = vpop.xlane.xlu0 %652 }
 0x4cb   : > { %v654_v36 = vmul.f32 0.03125, %v653_v35 }
 0x4cd   : > { %v655_v37 = vadd.f32 1e-05, %v654_v36 }
 0x4cf   : > { %1046 = vrsqrt.f32 %v655_v37 }
 0x4d9   : > { %v1047_v38 = vpop.eup %1046 }
 0x4da   : > { %v657_v40 = vmul.f32 %v1047_v38, %v649_v27 }
 0x4dc   : > { %v658_v42 = vmul.f32 %v657_v40, %v641_v39 }
 0x4de   : > { %v659_v43 = vadd.f32 %v658_v42, %v642_v41 }
 0x4e0   : > { %v660_v44 = vpack.c.bf16 %v659_v43, %v659_v43 }
 0x4e2   : > { %942 = vmatmul.mubr.bf16.vlgmr.msra.gmra.mrb[0].mxu0 %v660_v44 }
 0x5b5   : > { %v760_v46 = vpop.f32.mrb[0].mxu0 }
 0x5b6   : > { %v761_v47 = vadd.f32 %v760_v46, %v677_v45  ;;  %v943_v48 = vpop.f32.mrb[1].mxu0 }
 0x5b7   : > { %v763_v49 = vpop.f32.mrb[2].mxu0 }
 0x5b8   : > { %766 = vst [vmem:[%s1290_s13] sm:$0x1] %v761_v47  ;;  %v944_v50 = vpop.f32.mrb[3].mxu0 }
 0x5b9 PF: > { %s884_s14 = sshll.u32 %s1130_s21, 4  ;;  %s780_s20 = sshll.u32 %s1290_s13, 4  ;;  %s781_s20 = int_to_ptr.vmem [resolvable:$true] %s780_s20 }
 0x5ba   : > { %s1387_s25 = scalar_lea.hbm %s1448_s11, %s884_s14  ;;  %s768_s26 = scalar_lea.sflag [#allocation4], %s400_s15 }
 0x5bb   : > { %s1048_s27 = scalar_lea.vmem %s781_s20, 16  ;;  %s1149_s23 = smov [#allocation3]  }
 0x5bc   : > { %p1049_p2 = scmp.ne.s32.totalorder %s781_s20, %s1048_s27  ;;  %s1052_s22 = sshll.u32 %s1149_s23, 4  ;;  %s1053_s22 = int_to_ptr.vmem [resolvable:$false] %s1052_s22 }
 0x5bd   : > { %s1054_s28 = scalar_lea.vmem %s1053_s22, 32  ;;  %p1055_p6 = scmp.lt.s32.totalorder %s781_s20, %s1053_s22 }
 0x5be   : > { %p1050_p4 = pnand %p1049_p2, %p1259_p3  ;;  %p1056_p7 = scmp.lt.s32.totalorder %s1054_s28, %s1048_s27 }
 0x5c0   : > { %p1051_p5 = pneg %p1050_p4  ;;  %p1057_p8 = por %p1056_p7, %p1055_p6 }
 0x5c2   : > { %p1058_p10 = pnand %p1057_p8, %p1051_p5 }
 0x5c4   : > { %1061 = shalt.err (!%p1058_p10)
}
 0x5c5   : > { %s1062_s21 = scalar_lea.hbm %s1387_s25, 16  ;;  %s1066_s19 = scalar_lea.hbm %s1448_s11, 32 }
 0x5c6   : > { %p1063_p11 = scmp.ne.s32.totalorder %s1387_s25, %s1062_s21  ;;  %p1067_p0 = scmp.lt.u32.totalorder %s1387_s25, %s1448_s11 }
 0x5c7   : > { %p1068_p1 = scmp.lt.u32.totalorder %s1066_s19, %s1062_s21  ;;  %p1070_p4 = scmp.lt.u32.totalorder %s1062_s21, %s1387_s25 }
 0x5c8   : > { %p1064_p12 = pnand %p1063_p11, %p1259_p3 }
 0x5c9   : > { %p1069_p2 = por %p1068_p1, %p1067_p0 }
 0x5ca   : > { %p1065_p13 = pneg %p1064_p12 }
 0x5cb   : > { %p1071_p5 = por %p1070_p4, %p1069_p2 }
 0x5cd   : > { %p1072_p6 = pnand %p1071_p5, %p1065_p13 }
 0x5cf   : > { %1075 = shalt.err (!%p1072_p6)
}
 0x5d0   : > { %945 = dma.vmem_to_hbm [thread:$0]  (%p1259_p3), %s781_s20, 16, %s1387_s25, %s768_s26  }
 0x5d1 PF: > { %p951_p7 = scmp.ge.s32.totalorder %s1142_s24, 2  ;;  %s792_s12 = sand.u32 1, %s1114_s17  }
 0x5d2   : > { %s793_s27 = scalar_lea.sflag [#allocation4], %s792_s12 }
 0x5d3   : > { %p948_p8 = pnand %p951_p7, %p1269_p9 }
 0x5d5   : > { %1109 = dma.done.wait (!%p948_p8), %s793_s27, 16  }
 0x5d6   : > { %1111 = vsyncadd (!%p948_p8), %s793_s27, 4294967280  ;;  %s24_s24 = sadd.s32 1, %s1142_s24   ;;  %s1461_s23 = sld [smem:[#allocation6_spill]] }
 0x5d7   : > { %p21_p10 = scmp.ge.s32.totalorder %s24_s24, 10   ;;  %s1462_s19 = sld [smem:[#allocation11_spill]] }
 0x5d8   : > { %s1463_s20 = sld [smem:[#allocation7_spill]]  ;;  %s1464_s21 = sld [smem:[#allocation8_spill]] }
 0x5d9   : > { %s1465_s22 = sld [smem:[#allocation9_spill]]  ;;  %s1466_s29 = sld [smem:[#allocation10_spill]] }
 0x5da   : > { %s1467_s17 = smov %s1118_s18  ;;  %23 = sbr.rel (!%p21_p10) target bundleno = 5 (0x5), region = 107 }
 0x5dc   : > { %s1468_s18 = smov %s1461_s23 }
 0x5df   : > { %s1469_s23 = smov %s1466_s29 }
 0x5e1   :  { %797 = vsyncpa [#allocation4], 1 }
 0x5e2   :  { %799 = vsyncpa [#allocation4 + $0x1], 1 }

</bundles_post_ra>
